<compile_context>
chip_gen: v7x
topology: tpu7x:2x2x1
jax: 0.10.0
libtpu: 0.0.40
codegen_flags: <defaults>
</compile_context>

<pallas_src>
import functools

import jax
import jax.numpy as jnp
from jax.experimental import pallas as pl
from jax.experimental.pallas import tpu as pltpu

EPS = 1e-6


def _residual_kernel(alpha_ref, beta_ref, x_ref, w_ref, b_ref, o_ref, *, matmul_dtype):
    # x_ref: (TM, D) tile of the flattened input, VMEM
    # w_ref: (D, D) full linear weight (already cast to matmul_dtype in wrapper)
    # b_ref: (1, D) linear bias (f32)
    # alpha_ref / beta_ref: (1,) LayerNorm scalar params, SMEM
    x = x_ref[...].astype(jnp.float32)
    d = x.shape[-1]

    alpha = alpha_ref[0]
    beta = beta_ref[0]

    # --- LayerNormalization (torch semantics: unbiased std, eps added to std) ---
    mean = jnp.mean(x, axis=-1, keepdims=True)
    xc = x - mean
    var_unbiased = jnp.sum(xc * xc, axis=-1, keepdims=True) * (1.0 / (d - 1))
    std = jnp.sqrt(var_unbiased)
    # Exact divide on a (tm, 1) column — negligible cost next to the (tm, D) work,
    # and avoids the approx-reciprocal error that broke bit-level parity.
    scale = alpha / (std + EPS)
    normed = xc * scale + beta

    # --- sublayer: Linear(D, D) on the MXU (f32 accumulation) ---
    lhs = normed.astype(matmul_dtype) if matmul_dtype is not None else normed
    y = jnp.dot(lhs, w_ref[...], preferred_element_type=jnp.float32)
    y = y + b_ref[...].astype(jnp.float32)

    # --- dropout (eval mode => identity) + residual add ---
    o_ref[...] = (x + y).astype(o_ref.dtype)


def _round_up(x, m):
    return ((x + m - 1) // m) * m


def residual_connection_layer(x, w, b, alpha, beta, *, tm=512, matmul_dtype=jnp.bfloat16):
    """x: [B, S, D]; w: [D, D]; b: [D]; alpha, beta: [1] (LayerNorm params).

    tm: requested row tile (multiple of 8).  matmul_dtype: dtype of MXU operands
    (default bf16, f32 accumulation).  Pass None for full-f32 matmul operands.
    """
    B, S, D = x.shape
    M = B * S
    x2 = x.reshape(M, D)
    b2 = b.reshape(1, D).astype(jnp.float32)
    alpha1 = jnp.asarray(alpha, jnp.float32).reshape(1)
    beta1 = jnp.asarray(beta, jnp.float32).reshape(1)

    # Cast W once in the wrapper (grid-invariant): halves its HBM->VMEM DMA and
    # VMEM footprint for bf16, and removes per-step VPU casts from the body.
    w_cast = w.astype(matmul_dtype) if matmul_dtype is not None else w.astype(jnp.float32)

    # --- generation-aware VMEM budgeting -------------------------------------
    try:
        vmem_cap = int(pltpu.get_tpu_info().vmem_capacity_bytes)
    except Exception:
        vmem_cap = 64 * 1024 * 1024  # conservative: v7x per-TensorCore
    soft_cap = int(0.75 * vmem_cap)

    x_item = jnp.dtype(x.dtype).itemsize
    w_item = jnp.dtype(w_cast.dtype).itemsize

    def vmem_est(t, w_bufs):
        tile = t * D
        return (2 * tile * x_item            # double-buffered input tile
                + 2 * tile * x_item          # double-buffered output tile
                + 3 * tile * 4               # in-kernel f32 temporaries (xc/normed/y)
                + w_bufs * D * D * w_item    # resident weight
                + 2 * D * 4)                 # bias

    def pick_tm(w_bufs):
        t = min(tm, M)
        # Keep >= ~4 grid steps: feeds v7x's 2nd TensorCore (parallel axis) and
        # gives the software pipeline something to overlap.
        t = min(t, max(8, -(-M // 4)))
        t = max(8, _round_up(t, 8))
        while t > 8 and vmem_est(t, w_bufs) > soft_cap:
            t = max(8, _round_up(t // 2, 8))
        return t

    kernel = functools.partial(_residual_kernel, matmul_dtype=matmul_dtype)

    def run(w_bufs):
        t = pick_tm(w_bufs)
        Mp = _round_up(M, t)
        xp = jnp.pad(x2, ((0, Mp - M), (0, 0))) if Mp != M else x2  # padded rows benign
        vmem_limit = int(min(0.9 * vmem_cap,
                             max(32 * 1024 * 1024, vmem_est(t, w_bufs) + (8 << 20))))
        # Grid-invariant W / bias: single-buffer when supported.
        const_kwargs = {"pipeline_mode": pl.Buffered(1)} if w_bufs == 1 else {}

        call = pl.pallas_call(
            kernel,
            out_shape=jax.ShapeDtypeStruct((Mp, D), x.dtype),
            grid_spec=pltpu.PrefetchScalarGridSpec(
                num_scalar_prefetch=0,
                grid=(Mp // t,),
                in_specs=[
                    pl.BlockSpec(memory_space=pltpu.MemorySpace.SMEM),         # alpha
                    pl.BlockSpec(memory_space=pltpu.MemorySpace.SMEM),         # beta
                    pl.BlockSpec((t, D), lambda i: (i, 0)),                    # x tile
                    pl.BlockSpec((D, D), lambda i: (0, 0), **const_kwargs),    # W
                    pl.BlockSpec((1, D), lambda i: (0, 0), **const_kwargs),    # bias
                ],
                out_specs=pl.BlockSpec((t, D), lambda i: (i, 0)),              # lane-dense
            ),
            compiler_params=pltpu.CompilerParams(
                dimension_semantics=("parallel",),   # shard rows across TCs (v7x)
                vmem_limit_bytes=vmem_limit,
            ),
        )
        out = call(alpha1, beta1, xp, w_cast, b2)
        return out[:M] if Mp != M else out

    try:
        out = run(w_bufs=1)
    except Exception:
        # Environments without per-BlockSpec pipeline_mode: rebuild with the
        # default double-buffered W, re-capping tm and the VMEM limit for w_bufs=2.
        out = run(w_bufs=2)

    return out.reshape(B, S, D)


if __name__ == "__main__":
    B, S, D = 2, 8, 128
    key = jax.random.PRNGKey(0)
    kx, kw, kb = jax.random.split(key, 3)

    x = jax.random.normal(kx, (B, S, D), dtype=jnp.float32)
    # Deterministic sublayer (Linear(D, D)) parameters.
    w = jax.random.normal(kw, (D, D), dtype=jnp.float32) * (1.0 / float(D) ** 0.5)
    b = jax.random.normal(kb, (D,), dtype=jnp.float32) * 0.01
    # LayerNormalization params: alpha=1, bias=0 (as in __init__).
    alpha = jnp.ones((1,), dtype=jnp.float32)
    beta = jnp.zeros((1,), dtype=jnp.float32)

    # Pure-JAX reference (same semantics as the PyTorch module), exact math.
    mean = jnp.mean(x, axis=-1, keepdims=True)
    xc = x - mean
    std = jnp.sqrt(jnp.sum(xc * xc, axis=-1, keepdims=True) / (D - 1))
    normed = alpha[0] * xc / (std + EPS) + beta[0]
    dn = (((1,), (0,)), ((), ()))
    y_exact = jax.lax.dot_general(normed.reshape(-1, D), w, dn,
                                  precision=jax.lax.Precision.HIGHEST,
                                  preferred_element_type=jnp.float32).reshape(B, S, D)
    ref_f32 = x + (y_exact + b)

    # 1) Full-precision matmul path (matmul_dtype=None): semantics check.
    out_f32 = residual_connection_layer(x, w, b, alpha, beta, matmul_dtype=None)
    jax.block_until_ready(out_f32)
    assert jnp.allclose(out_f32, ref_f32, atol=2e-2, rtol=2e-2), "f32 path mismatch"

    # 2) Default path (bf16 MXU operands, f32 accumulation): compare against a
    #    reference that uses the same bf16 operand rounding.
    out_bf = residual_connection_layer(x, w, b, alpha, beta)
    jax.block_until_ready(out_bf)
    y_bf = jax.lax.dot_general(normed.reshape(-1, D).astype(jnp.bfloat16),
                               w.astype(jnp.bfloat16), dn,
                               preferred_element_type=jnp.float32).reshape(B, S, D)
    ref_bf = x + (y_bf + b)
    assert jnp.allclose(out_bf, ref_bf, atol=1e-2, rtol=1e-2), "bf16 path mismatch (matched ref)"
    assert jnp.allclose(out_bf, ref_f32, atol=1e-1, rtol=1e-1), "bf16 path mismatch (exact ref)"

    print("KERNEL_OK")
</pallas_src>

<mosaic_0001>
module attributes {stable_mosaic.version = 11 : i64} {
  func.func @_residual_kernel(%arg0: i32, %arg1: memref<1xf32, #tpu.memory_space<smem>>, %arg2: memref<1xf32, #tpu.memory_space<smem>>, %arg3: memref<8x128xf32, #tpu.memory_space<vmem>>, %arg4: memref<128x128xf32, #tpu.memory_space<vmem>>, %arg5: memref<1x128xf32, #tpu.memory_space<vmem>>, %arg6: memref<8x128xf32, #tpu.memory_space<vmem>>) attributes {dimension_semantics = [#tpu.dimension_semantics<parallel>], iteration_bounds = array<i64: 2>, scalar_prefetch = 0 : i64, scratch_operands = 0 : i64, tpu.core_type = #tpu.core_type<tc>, window_params = [{transform_indices = @transform_0, window_bounds = array<i64: 1>}, {transform_indices = @transform_1, window_bounds = array<i64: 1>}, {transform_indices = @transform_2, window_bounds = array<i64: 8, 128>}, {pipeline_mode = #tpu.pipeline_mode<synchronous>, transform_indices = @transform_3, window_bounds = array<i64: 128, 128>}, {pipeline_mode = #tpu.pipeline_mode<synchronous>, transform_indices = @transform_4, window_bounds = array<i64: 1, 128>}, {transform_indices = @transform_5, window_bounds = array<i64: 8, 128>}]} {
    %c0 = arith.constant 0 : index
    %c0_0 = arith.constant 0 : index
    %0 = vector.load %arg3[%c0, %c0_0] : memref<8x128xf32, #tpu.memory_space<vmem>>, vector<8x128xf32>
    %c0_1 = arith.constant 0 : index
    %1 = memref.load %arg1[%c0_1] : memref<1xf32, #tpu.memory_space<smem>>
    %c0_2 = arith.constant 0 : index
    %2 = memref.load %arg2[%c0_2] : memref<1xf32, #tpu.memory_space<smem>>
    %cst = arith.constant dense<0.000000e+00> : vector<8xf32>
    %3 = vector.multi_reduction <add>, %0, %cst [1] : vector<8x128xf32> to vector<8xf32>
    %4 = vector.shape_cast %3 : vector<8xf32> to vector<8x1xf32>
    %cst_3 = arith.constant 1.280000e+02 : f32
    %5 = vector.broadcast %cst_3 : f32 to vector<8x1xf32>
    %6 = arith.divf %4, %5 : vector<8x1xf32>
    %7 = vector.broadcast %6 : vector<8x1xf32> to vector<8x128xf32>
    %8 = arith.subf %0, %7 : vector<8x128xf32>
    %9 = arith.mulf %8, %8 : vector<8x128xf32>
    %cst_4 = arith.constant dense<0.000000e+00> : vector<8xf32>
    %10 = vector.multi_reduction <add>, %9, %cst_4 [1] : vector<8x128xf32> to vector<8xf32>
    %11 = vector.shape_cast %10 : vector<8xf32> to vector<8x1xf32>
    %cst_5 = arith.constant 0.00787401571 : f32
    %12 = vector.broadcast %cst_5 : f32 to vector<8x1xf32>
    %13 = arith.mulf %11, %12 : vector<8x1xf32>
    %14 = math.sqrt %13 : vector<8x1xf32>
    %cst_6 = arith.constant 9.99999997E-7 : f32
    %15 = vector.broadcast %cst_6 : f32 to vector<8x1xf32>
    %16 = arith.addf %14, %15 : vector<8x1xf32>
    %17 = vector.broadcast %1 : f32 to vector<8x1xf32>
    %18 = arith.divf %17, %16 : vector<8x1xf32>
    %19 = vector.broadcast %18 : vector<8x1xf32> to vector<8x128xf32>
    %20 = arith.mulf %8, %19 : vector<8x128xf32>
    %21 = vector.broadcast %2 : f32 to vector<8x128xf32>
    %22 = arith.addf %20, %21 : vector<8x128xf32>
    %c0_7 = arith.constant 0 : index
    %c0_8 = arith.constant 0 : index
    %23 = vector.load %arg4[%c0_7, %c0_8] : memref<128x128xf32, #tpu.memory_space<vmem>>, vector<128x128xf32>
    %cst_9 = arith.constant dense<0.000000e+00> : vector<8x128xf32>
    %24 = tpu.matmul %22, %23, %cst_9 {dimension_numbers = #tpu.dot_dimension_numbers<[1], [0], [0], [1], [0, 0, 1, 1], [], []>} : vector<8x128xf32>, vector<128x128xf32>, vector<8x128xf32> -> vector<8x128xf32>
    %c0_10 = arith.constant 0 : index
    %c0_11 = arith.constant 0 : index
    %25 = vector.load %arg5[%c0_10, %c0_11] : memref<1x128xf32, #tpu.memory_space<vmem>>, vector<1x128xf32>
    %26 = vector.broadcast %25 : vector<1x128xf32> to vector<8x128xf32>
    %27 = arith.addf %24, %26 : vector<8x128xf32>
    %28 = arith.addf %0, %27 : vector<8x128xf32>
    %c0_12 = arith.constant 0 : index
    %c0_13 = arith.constant 0 : index
    %29 = vector.load %arg6[%c0_12, %c0_13] : memref<8x128xf32, #tpu.memory_space<vmem>>, vector<8x128xf32>
    tpu.vector_store %arg6[%c0_12, %c0_13], %28 {strides = array<i32>} : memref<8x128xf32, #tpu.memory_space<vmem>>, vector<8x128xf32>,
    return
  }
  func.func @transform_0(%arg0: i32) -> i32 {
    %c0_i32 = arith.constant 0 : i32
    %c0_i32_0 = arith.constant 0 : i32
    return %c0_i32 : i32
  }
  func.func @transform_1(%arg0: i32) -> i32 {
    %c0_i32 = arith.constant 0 : i32
    %c0_i32_0 = arith.constant 0 : i32
    return %c0_i32 : i32
  }
  func.func @transform_2(%arg0: i32) -> (i32, i32) {
    %c0_i32 = arith.constant 0 : i32
    %c0_i32_0 = arith.constant 0 : i32
    return %arg0, %c0_i32 : i32, i32
  }
  func.func @transform_3(%arg0: i32) -> (i32, i32) {
    %c0_i32 = arith.constant 0 : i32
    %c0_i32_0 = arith.constant 0 : i32
    %c0_i32_1 = arith.constant 0 : i32
    return %c0_i32, %c0_i32_0 : i32, i32
  }
  func.func @transform_4(%arg0: i32) -> (i32, i32) {
    %c0_i32 = arith.constant 0 : i32
    %c0_i32_0 = arith.constant 0 : i32
    %c0_i32_1 = arith.constant 0 : i32
    return %c0_i32, %c0_i32_0 : i32, i32
  }
  func.func @transform_5(%arg0: i32) -> (i32, i32) {
    %c0_i32 = arith.constant 0 : i32
    %c0_i32_0 = arith.constant 0 : i32
    return %arg0, %c0_i32 : i32, i32
  }
}

module attributes {stable_mosaic.version = 11 : i64} {
  func.func @_residual_kernel(%arg0: i32, %arg1: memref<1xf32, #tpu.memory_space<smem>>, %arg2: memref<1xf32, #tpu.memory_space<smem>>, %arg3: memref<8x128xf32, #tpu.memory_space<vmem>>, %arg4: memref<128x128xf32, #tpu.memory_space<vmem>>, %arg5: memref<1x128xf32, #tpu.memory_space<vmem>>, %arg6: memref<8x128xf32, #tpu.memory_space<vmem>>) attributes {dimension_semantics = [#tpu.dimension_semantics<parallel>], iteration_bounds = array<i64: 2>, scalar_prefetch = 0 : i64, scratch_operands = 0 : i64, tpu.core_type = #tpu.core_type<tc>, window_params = [{transform_indices = @transform_0, window_bounds = array<i64: 1>}, {transform_indices = @transform_1, window_bounds = array<i64: 1>}, {transform_indices = @transform_2, window_bounds = array<i64: 8, 128>}, {pipeline_mode = #tpu.pipeline_mode<synchronous>, transform_indices = @transform_3, window_bounds = array<i64: 128, 128>}, {pipeline_mode = #tpu.pipeline_mode<synchronous>, transform_indices = @transform_4, window_bounds = array<i64: 1, 128>}, {transform_indices = @transform_5, window_bounds = array<i64: 8, 128>}]} {
    %c0 = arith.constant 0 : index
    %c0_0 = arith.constant 0 : index
    %0 = vector.load %arg3[%c0, %c0_0] : memref<8x128xf32, #tpu.memory_space<vmem>>, vector<8x128xf32>
    %c0_1 = arith.constant 0 : index
    %1 = memref.load %arg1[%c0_1] : memref<1xf32, #tpu.memory_space<smem>>
    %c0_2 = arith.constant 0 : index
    %2 = memref.load %arg2[%c0_2] : memref<1xf32, #tpu.memory_space<smem>>
    %cst = arith.constant dense<0.000000e+00> : vector<8xf32>
    %3 = vector.multi_reduction <add>, %0, %cst [1] : vector<8x128xf32> to vector<8xf32>
    %4 = vector.shape_cast %3 : vector<8xf32> to vector<8x1xf32>
    %cst_3 = arith.constant 1.280000e+02 : f32
    %5 = vector.broadcast %cst_3 : f32 to vector<8x1xf32>
    %6 = arith.divf %4, %5 : vector<8x1xf32>
    %7 = vector.broadcast %6 : vector<8x1xf32> to vector<8x128xf32>
    %8 = arith.subf %0, %7 : vector<8x128xf32>
    %9 = arith.mulf %8, %8 : vector<8x128xf32>
    %cst_4 = arith.constant dense<0.000000e+00> : vector<8xf32>
    %10 = vector.multi_reduction <add>, %9, %cst_4 [1] : vector<8x128xf32> to vector<8xf32>
    %11 = vector.shape_cast %10 : vector<8xf32> to vector<8x1xf32>
    %cst_5 = arith.constant 0.00787401571 : f32
    %12 = vector.broadcast %cst_5 : f32 to vector<8x1xf32>
    %13 = arith.mulf %11, %12 : vector<8x1xf32>
    %14 = math.sqrt %13 : vector<8x1xf32>
    %cst_6 = arith.constant 9.99999997E-7 : f32
    %15 = vector.broadcast %cst_6 : f32 to vector<8x1xf32>
    %16 = arith.addf %14, %15 : vector<8x1xf32>
    %17 = vector.broadcast %1 : f32 to vector<8x1xf32>
    %18 = arith.divf %17, %16 : vector<8x1xf32>
    %19 = vector.broadcast %18 : vector<8x1xf32> to vector<8x128xf32>
    %20 = arith.mulf %8, %19 : vector<8x128xf32>
    %21 = vector.broadcast %2 : f32 to vector<8x128xf32>
    %22 = arith.addf %20, %21 : vector<8x128xf32>
    %c0_7 = arith.constant 0 : index
    %c0_8 = arith.constant 0 : index
    %23 = vector.load %arg4[%c0_7, %c0_8] : memref<128x128xf32, #tpu.memory_space<vmem>>, vector<128x128xf32>
    %cst_9 = arith.constant dense<0.000000e+00> : vector<8x128xf32>
    %24 = tpu.matmul %22, %23, %cst_9 {dimension_numbers = #tpu.dot_dimension_numbers<[1], [0], [0], [1], [0, 0, 1, 1], [], []>} : vector<8x128xf32>, vector<128x128xf32>, vector<8x128xf32> -> vector<8x128xf32>
    %c0_10 = arith.constant 0 : index
    %c0_11 = arith.constant 0 : index
    %25 = vector.load %arg5[%c0_10, %c0_11] : memref<1x128xf32, #tpu.memory_space<vmem>>, vector<1x128xf32>
    %26 = vector.broadcast %25 : vector<1x128xf32> to vector<8x128xf32>
    %27 = arith.addf %24, %26 : vector<8x128xf32>
    %28 = arith.addf %0, %27 : vector<8x128xf32>
    %c0_12 = arith.constant 0 : index
    %c0_13 = arith.constant 0 : index
    %29 = vector.load %arg6[%c0_12, %c0_13] : memref<8x128xf32, #tpu.memory_space<vmem>>, vector<8x128xf32>
    tpu.vector_store %arg6[%c0_12, %c0_13], %28 {strides = array<i32>} : memref<8x128xf32, #tpu.memory_space<vmem>>, vector<8x128xf32>,
    return
  }
  func.func @transform_0(%arg0: i32) -> i32 {
    %c0_i32 = arith.constant 0 : i32
    %c0_i32_0 = arith.constant 0 : i32
    return %c0_i32 : i32
  }
  func.func @transform_1(%arg0: i32) -> i32 {
    %c0_i32 = arith.constant 0 : i32
    %c0_i32_0 = arith.constant 0 : i32
    return %c0_i32 : i32
  }
  func.func @transform_2(%arg0: i32) -> (i32, i32) {
    %c0_i32 = arith.constant 0 : i32
    %c0_i32_0 = arith.constant 0 : i32
    return %arg0, %c0_i32 : i32, i32
  }
  func.func @transform_3(%arg0: i32) -> (i32, i32) {
    %c0_i32 = arith.constant 0 : i32
    %c0_i32_0 = arith.constant 0 : i32
    %c0_i32_1 = arith.constant 0 : i32
    return %c0_i32, %c0_i32_0 : i32, i32
  }
  func.func @transform_4(%arg0: i32) -> (i32, i32) {
    %c0_i32 = arith.constant 0 : i32
    %c0_i32_0 = arith.constant 0 : i32
    %c0_i32_1 = arith.constant 0 : i32
    return %c0_i32, %c0_i32_0 : i32, i32
  }
  func.func @transform_5(%arg0: i32) -> (i32, i32) {
    %c0_i32 = arith.constant 0 : i32
    %c0_i32_0 = arith.constant 0 : i32
    return %arg0, %c0_i32 : i32, i32
  }
}

</mosaic_0001>

<bundles_post_ra>
// kernel: tpu_custom_call.1
= control target key start
LH: loop header
LB: loop body
LE: loop exit
PB: predicated region body
PF: predicated region fallthrough
CT: control target
= control target key end

     0   :  { %s1016_s0 = inlined_call_operand.<no memory space> [shape: f32[1], index: 0, kind: input, shape index: {}]   ;;  %s1017_s1 = inlined_call_operand.<no memory space> [shape: f32[1], index: 1, kind: input, shape index: {}]   ;;  %s1018_s2 = inlined_call_operand.hbm [shape: f32[16,128], index: 2, kind: input, shape index: {}]   ;;  %s1019_s3 = inlined_call_operand.hbm [shape: f32[128,128], index: 3, kind: input, shape index: {}]   ;;  %s1020_s4 = inlined_call_operand.vmem [shape: f32[1,128], index: 4, kind: input, shape index: {}]   ;;  %s1021_s5 = inlined_call_operand.hbm [shape: f32[16,128], index: 5, kind: output, shape index: {}]  }
   0x1   :  { %10 = sst [smem:[#allocation2]] %s1016_s0 }
   0x2   :  { %11 = sst [smem:[#allocation3]] %s1017_s1 }
   0x3   :  { %12 = vsyncpa [#allocation5], 0 }
   0x4   :  { %14 = vsyncpa [#allocation5 + $0x1], 0 }
   0x5   :  { %15 = vsyncpa [#allocation8], 0 }
   0x6   :  { %16 = vsyncpa [#allocation6], 0 }
   0x7   :  { %18 = vsyncpa [#allocation6 + $0x1], 0  ;;  %s803_s22 = smov 0   ;;  %s805_s23 = smov 0  }
   0x8   :  { %s807_s24 = smov 0   ;;  %s809_s25 = smov 0  }
   0x9 LB: > { %s824_s0 = sadd.s32 4294967295, %s757_s25   ;;  %s472_s1 = sadd.s32 4294967294, %s757_s25   ;;  %s757_s25 = sphi %s809_s25, %s1041_s25   ;;  %s753_s24 = sphi %s807_s24, %s1040_s24   ;;  %s749_s23 = sphi %s805_s23, %s1039_s23   ;;  %s745_s22 = sphi %s803_s22, %s1038_s22  }
   0xa   : > { %p86_p0 = scmp.ne.s32.totalorder %s749_s23, %s745_s22  ;;  %p1022_p1 = scmp.eq.s32.totalorder %s824_s0, 0 }
   0xb   : > { %p158_p3 = scmp.eq.s32.totalorder %s472_s1, 1  ;;  %p473_p5 = scmp.ge.s32.totalorder %s757_s25, 1 }
   0xc   : > { %p833_p4 = por %p1022_p1, %p86_p0  ;;  %p165_p7 = scmp.lt.s32.totalorder %s757_s25, 3 }
   0xd   : > { %p838_p6 = por %p158_p3, %p86_p0  ;;  %s759_s29 = smov [#allocation7]  }
   0xe   : > { %s1025_s26 = scalar_select %p833_p4, 1, 0 }
   0xf   : > { %s1026_s27 = scalar_select %p838_p6, 1, 0 }
  0x10   : > { %p843_p8 = pnand %p473_p5, %p165_p7  ;;  %s183_s30 = sshll.u32 %s759_s29, 4  ;;  %s847_s30 = int_to_ptr.vmem [resolvable:$true] %s183_s30 }
  0x11   : > { %s859_s7 = sadd.s32 1, %s757_s25   ;;  %s73_s8 = sadd.s32 1, %s753_s24 }
  0x12   : > { %s1027_s28 = scalar_select %p843_p8, 1, 0 }
  0x13   : > { %p571_p9 = pneg %p843_p8  ;;  %s70_s9 = ssub.s32 %s757_s25, %s859_s7 }
  0x14   : > { %s629_s12 = scalar_lea.hbm %s1019_s3, 2048 }
  0x15   : > { %p854_p11 = pnand %p571_p9, %p1022_p1  ;;  %p630_p12 = scmp.ne.s32.totalorder %s1019_s3, %s629_s12 }
  0x16   : > { %p636_p5 = scmp.lt.u32.totalorder %s629_s12, %s1019_s3 }
  0x17   : > { %p631_p13 = pneg %p854_p11 }
  0x19   : > { %p632_p0 = pnand %p631_p13, %p630_p12 }
  0x1b   : > { %p633_p3 = pneg %p632_p0 }
  0x1d   : > { %p638_p7 = pnand %p636_p5, %p633_p3 }
  0x1f   : > { %641 = shalt.err (!%p638_p7)
}
  0x20   : > { %s642_s17 = scalar_lea.vmem %s847_s30, 2048  ;;  %p650_p2 = scmp.lt.s32.totalorder %s847_s30, %s847_s30 }
  0x21   : > { %p643_p9 = scmp.ne.s32.totalorder %s847_s30, %s642_s17  ;;  %p651_p6 = scmp.lt.s32.totalorder %s642_s17, %s642_s17 }
  0x23   : > { %p645_p10 = pnand %p643_p9, %p631_p13  ;;  %p652_p4 = por %p651_p6, %p650_p2 }
  0x25   : > { %p646_p1 = pneg %p645_p10 }
  0x27   : > { %p653_p8 = pnand %p652_p4, %p646_p1 }
  0x29   : > { %656 = shalt.err (!%p653_p8)
}
  0x2a   : > { %s760_s18 = smov 128   ;;  %s761_s19 = smov 8  }
  0x2b   : > { %574 = dma.hbm_to_vmem [thread:$0]  (!%p854_p11), %s1019_s3, 2048, %s847_s30, [#allocation8], %s760_s18, %s760_s18, %s761_s19  }
  0x2c   : > { %p71_p2 = scmp.eq.s32.totalorder %s70_s9, 0  ;;  %p80_p1 = scmp.ne.s32.totalorder %s753_s24, %s749_s23 }
  0x2d   : > { %p81_p4 = scmp.eq.s32.totalorder %s757_s25, 0  ;;  %p584_p6 = scmp.lt.s32.totalorder %s757_s25, 2 }
  0x2e   : > { %s890_s1 = scalar_select %p71_p2, %s753_s24, %s73_s8  }
  0x2f   : > { %p82_p8 = por %p81_p4, %p80_p1  ;;  %p1029_p10 = scmp.eq.s32.totalorder %s824_s0, 1 }
  0x30   : > { %s200_s10 = sand.u32 1, %s753_s24   ;;  %s477_s11 = sshll.u32 %s757_s25, 7 }
  0x31   : > { %p894_p12 = por %p1029_p10, %p80_p1  ;;  %s476_s12 = sshll.u32 %s200_s10, 3 }
  0x32   : > { %s903_s14 = scalar_lea.hbm %s1018_s2, %s477_s11  ;;  %s204_s30 = scalar_lea.vmem [#allocation4], %s476_s12 }
  0x33   : > { %s211_s8 = sshll.u32 %s204_s30, 4  ;;  %p905_p11 = pnand %p584_p6, %p82_p8  ;;  %s909_s8 = int_to_ptr.vmem [resolvable:$true] %s211_s8 }
  0x34   : > { %s201_s15 = scalar_lea.sflag [#allocation5], %s200_s10  ;;  %s657_s16 = scalar_lea.hbm %s903_s14, 128 }
  0x35   : > { %p658_p13 = scmp.ne.s32.totalorder %s903_s14, %s657_s16  ;;  %p659_p0 = pneg %p905_p11 }
  0x36   : > { %s662_s19 = scalar_lea.hbm %s1018_s2, 256  ;;  %p663_p7 = scmp.lt.u32.totalorder %s903_s14, %s1018_s2 }
  0x37   : > { %p660_p3 = pnand %p659_p0, %p658_p13  ;;  %p664_p9 = scmp.lt.u32.totalorder %s662_s19, %s657_s16 }
  0x38   : > { %p666_p1 = scmp.lt.u32.totalorder %s657_s16, %s903_s14 }
  0x39   : > { %p661_p5 = pneg %p660_p3  ;;  %p665_p2 = por %p664_p9, %p663_p7 }
  0x3b   : > { %p667_p4 = por %p666_p1, %p665_p2 }
  0x3d   : > { %p668_p6 = pnand %p667_p4, %p661_p5 }
  0x3f   : > { %671 = shalt.err (!%p668_p6)
}
  0x40   : > { %s672_s10 = scalar_lea.vmem %s909_s8, 128  ;;  %s762_s11 = smov [#allocation4]  }
  0x41   : > { %p673_p8 = scmp.ne.s32.totalorder %s909_s8, %s672_s10  ;;  %s677_s12 = sshll.u32 %s762_s11, 4  ;;  %s678_s12 = int_to_ptr.vmem [resolvable:$false] %s677_s12 }
  0x42   : > { %s679_s6 = scalar_lea.vmem %s678_s12, 256  ;;  %p680_p3 = scmp.lt.s32.totalorder %s909_s8, %s678_s12 }
  0x43   : > { %p675_p10 = pnand %p673_p8, %p659_p0  ;;  %p681_p7 = scmp.lt.s32.totalorder %s679_s6, %s672_s10 }
  0x45   : > { %p676_p13 = pneg %p675_p10  ;;  %p682_p9 = por %p681_p7, %p680_p3 }
  0x47   : > { %p683_p2 = pnand %p682_p9, %p676_p13 }
  0x49   : > { %686 = shalt.err (!%p683_p2)
}
  0x4a   : > { %578 = dma.hbm_to_vmem [thread:$0]  (!%p905_p11), %s903_s14, 128, %s909_s8, %s201_s15  }
  0x4b   : > { %p1032_p5 = scmp.ne.s32.totalorder %s1027_s28, 0 }
  0x4c   : > { %s939_s13 = sand.u32 (!%p1032_p5), 1, %s749_s23   ;;  %p1033_p0 = scmp.ne.s32.totalorder (!%p1032_p5), %s1025_s26, 0 }
  0x4d   : > { %220 = sbr.rel (%p1032_p5) target bundleno = 645 (0x285), region = 40  ;;  %s479_s30 = sshll.u32 (!%p1032_p5), %s939_s13, 3 }
  0x4e   : > { %s223_s16 = scalar_lea.sflag (!%p1032_p5), [#allocation5], %s939_s13  ;;  %s226_s17 = scalar_lea.vmem (!%p1032_p5), [#allocation4], %s479_s30 }
  0x54   : > { %732 = dma.done.wait (%p1033_p0), %s223_s16, 128  }
  0x55   : > { %734 = vsyncadd (%p1033_p0), %s223_s16, 4294967168  ;;  %p1034_p11 = scmp.eq.s32.totalorder %s824_s0, 0 }
  0x57   : > { %736 = dma.done.wait (%p1034_p11), [#allocation8], 2048   ;;  %p1035_p1 = pmov %p1034_p11 }
  0x58   : > { %v953_v0 = vld [vmem:[%s226_s17] sm:$0xff]  ;;  %v283_v5 = vld [vmem:[#allocation7] sm:$0xff]  ;;  %v284_v6 = vld [vmem:[#allocation7 + $0x8] sm:$0xff]  ;;  %v763_v8 = vmov 0.0|0.0   ;;  %vm764_vm0 = vmmov 0   ;;  %v765_v20 = vmov 0.0  }
  0x59   : > { %738 = vsyncadd (%p1035_p1), [#allocation8], 4294965248  ;;  %260 = vadd.xlane.f32.xlu0 %v953_v0  ;;  %v540_v7 = vpack.c.bf16 %v284_v6, %v283_v5  ;;  %539 = vmatprep.subr.bf16.mxu0 %v763_v8  ;;  %v285_v9 = vld [vmem:[#allocation7 + $0x10] sm:$0xff]  ;;  %v286_v10 = vld [vmem:[#allocation7 + $0x18] sm:$0xff]  ;;  %s258_s26 = sld [smem:[#allocation2]]  ;;  %s484_s9 = sshll.u32 %s824_s0, 7 }
  0x5a   : > { %v543_v11 = vpack.c.bf16 %v286_v10, %v285_v9  ;;  %v287_v12 = vld [vmem:[#allocation7 + $0x20] sm:$0xff]  ;;  %v288_v13 = vld [vmem:[#allocation7 + $0x28] sm:$0xff]  ;;  %v289_v15 = vld [vmem:[#allocation7 + $0x30] sm:$0xff]  ;;  %536 = vmatprep.mubr.msk.f32.mxu0 %vm764_vm0, %v765_v20  ;;  %s259_s28 = sld [smem:[#allocation3]]  ;;  %s256_s15 = scalar_lea.vmem [#allocation9], %s479_s30 }
  0x5b   : > { %541 = vmatpush3.bf16.msra.mxu0 %v540_v7  ;;  %v546_v14 = vpack.c.bf16 %v288_v13, %v287_v12  ;;  %v290_v16 = vld [vmem:[#allocation7 + $0x38] sm:$0xff]  ;;  %v291_v18 = vld [vmem:[#allocation7 + $0x40] sm:$0xff]  ;;  %v292_v19 = vld [vmem:[#allocation7 + $0x48] sm:$0xff]  ;;  %s392_s18 = sshll.u32 %s256_s15, 4  ;;  %s972_s21 = scalar_lea.hbm %s1021_s5, %s484_s9  ;;  %s974_s18 = int_to_ptr.vmem [resolvable:$true] %s392_s18 }
  0x5c   : > { %542 = vmatprep.subr.bf16.mxu0 %v763_v8  ;;  %v549_v17 = vpack.c.bf16 %v290_v16, %v289_v15  ;;  %v552_v21 = vpack.c.bf16 %v292_v19, %v291_v18  ;;  %v293_v22 = vld [vmem:[#allocation7 + $0x50] sm:$0xff]  ;;  %v294_v23 = vld [vmem:[#allocation7 + $0x58] sm:$0xff]  ;;  %v295_v25 = vld [vmem:[#allocation7 + $0x60] sm:$0xff]  ;;  %s379_s10 = scalar_lea.sflag [#allocation6], %s939_s13  ;;  %s687_s0 = scalar_lea.vmem %s974_s18, 128 }
  0x5d   : > { %v555_v24 = vpack.c.bf16 %v294_v23, %v293_v22  ;;  %v296_v26 = vld [vmem:[#allocation7 + $0x68] sm:$0xff]  ;;  %v297_v28 = vld [vmem:[#allocation7 + $0x70] sm:$0xff]  ;;  %v298_v29 = vld [vmem:[#allocation7 + $0x78] sm:$0xff]  ;;  %p688_p4 = scmp.ne.s32.totalorder %s974_s18, %s687_s0  ;;  %s766_s11 = smov [#allocation9]  }
  0x5e   : > { %v558_v27 = vpack.c.bf16 %v296_v26, %v295_v25  ;;  %v561_v30 = vpack.c.bf16 %v298_v29, %v297_v28  ;;  %v482_v45 = vld [vmem:[%s1020_s4] ss:$0 sm:$0xff]  ;;  %s691_s12 = sshll.u32 %s766_s11, 4  ;;  %s692_s12 = int_to_ptr.vmem [resolvable:$false] %s691_s12 }
  0x5f   : > { %544 = vmatpush3.bf16.msra.mxu0 %v543_v11  ;;  %v277_v39 = vstv %s258_s26  ;;  %p689_p6 = pnand %p688_p4, %p894_p12  ;;  %s693_s6 = scalar_lea.vmem %s692_s12, 256 }
  0x60   : > { %545 = vmatprep.subr.bf16.mxu0 %v763_v8  ;;  %v281_v42 = vstv %s259_s28  ;;  %p694_p10 = scmp.lt.s32.totalorder %s974_s18, %s692_s12  ;;  %p695_p13 = scmp.lt.s32.totalorder %s693_s6, %s687_s0 }
  0x61   : > { %p690_p8 = pneg %p689_p6 }
  0x62   : > { %p696_p3 = por %p695_p13, %p694_p10 }
  0x63   : > { %547 = vmatpush3.bf16.msra.mxu0 %v546_v14 }
  0x64   : > { %548 = vmatprep.subr.bf16.mxu0 %v763_v8  ;;  %p697_p7 = pnand %p696_p3, %p690_p8 }
  0x67   : > { %550 = vmatpush3.bf16.msra.mxu0 %v549_v17 }
  0x68   : > { %551 = vmatprep.subr.bf16.mxu0 %v763_v8 }
  0x6b   : > { %553 = vmatpush3.bf16.msra.mxu0 %v552_v21 }
  0x6c   : > { %554 = vmatprep.subr.bf16.mxu0 %v763_v8 }
  0x6f   : > { %556 = vmatpush3.bf16.msra.mxu0 %v555_v24 }
  0x70   : > { %557 = vmatprep.subr.bf16.mxu0 %v763_v8 }
  0x73   : > { %559 = vmatpush3.bf16.msra.mxu0 %v558_v27 }
  0x74   : > { %560 = vmatprep.subr.bf16.mxu0 %v763_v8 }
  0x77   : > { %562 = vmatpush3.bf16.msra.mxu0 %v561_v30 }
  0xe6   : > { %v261_v1 = vpop.xlane.xlu0 %260 }
  0xe7   : > { %v263_v2 = vmul.f32 0.0078125, %v261_v1 }
  0xe9   : > { %v957_v3 = vsub.f32 %v953_v0, %v263_v2 }
  0xeb   : > { %v265_v4 = vmul.f32 %v957_v3, %v957_v3 }
  0xed   : > { %266 = vadd.xlane.f32.xlu0 %v265_v4 }
 0x17a   : > { %v267_v31 = vpop.xlane.xlu0 %266 }
 0x17b   : > { %v268_v32 = vmul.f32 0.007874016, %v267_v31 }
 0x17d   : > { %625 = vrsqrt.f32 %v268_v32  ;;  %vm271_vm1 = vcmp.eq.f32.partialorder %v268_v32, inf  ;;  %v274_v35 = vand.u32 2147483648, %v268_v32  ;;  %vm273_vm2 = vcmp.eq.f32.partialorder %v268_v32, 0.0 }
 0x187   : > { %v626_v33 = vpop.eup %625 }
 0x188   : > { %v270_v34 = vmul.f32 %v626_v33, %v268_v32 }
 0x18a   : > { %v272_v36 = vsel %vm271_vm1, %v268_v32, %v270_v34 }
 0x18b   : > { %v275_v37 = vsel %vm273_vm2, %v274_v35, %v272_v36 }
 0x18c   : > { %v276_v38 = vadd.f32 1e-06, %v275_v37 }
 0x18e   : > { %627 = vrcp.f32 %v276_v38 }
 0x198   : > { %v628_v40 = vpop.eup %627 }
 0x199   : > { %v279_v41 = vmul.f32 %v628_v40, %v277_v39 }
 0x19b   : > { %v280_v43 = vmul.f32 %v279_v41, %v957_v3 }
 0x19d   : > { %v282_v44 = vadd.f32 %v281_v42, %v280_v43 }
 0x19f   : > { %537 = vmatmul.mubr.f32.vlgmr.msra.gmra.mrb[0].mxu0 %v282_v44 }
 0x272   : > { %v372_v46 = vpop.f32.mrb[0].mxu0 }
 0x273   : > { %v373_v47 = vadd.f32 %v482_v45, %v372_v46  ;;  %v538_v48 = vpop.f32.mrb[1].mxu0 }
 0x275   : > { %v376_v49 = vadd.f32 %v373_v47, %v953_v0 }
 0x277   : > { %377 = vst [vmem:[%s256_s15] sm:$0xff] %v376_v49 }
 0x278   : > { %700 = shalt.err (!%p697_p7)
}
 0x279   : > { %s701_s13 = scalar_lea.hbm %s972_s21, 128  ;;  %s705_s17 = scalar_lea.hbm %s1021_s5, 256 }
 0x27a   : > { %p702_p9 = scmp.ne.s32.totalorder %s972_s21, %s701_s13  ;;  %p706_p0 = scmp.lt.u32.totalorder %s972_s21, %s1021_s5 }
 0x27b   : > { %p707_p11 = scmp.lt.u32.totalorder %s705_s17, %s701_s13  ;;  %p709_p4 = scmp.lt.u32.totalorder %s701_s13, %s972_s21 }
 0x27c   : > { %p703_p2 = pnand %p702_p9, %p894_p12 }
 0x27d   : > { %p708_p1 = por %p707_p11, %p706_p0 }
 0x27e   : > { %p704_p5 = pneg %p703_p2 }
 0x27f   : > { %p710_p6 = por %p709_p4, %p708_p1 }
 0x281   : > { %p711_p8 = pnand %p710_p6, %p704_p5 }
 0x283   : > { %714 = shalt.err (!%p711_p8)
}
 0x284   : > { %569 = dma.vmem_to_hbm [thread:$0]  (%p894_p12), %s974_s18, 128, %s972_s21, %s379_s10  }
 0x285 PF: > { %s404_s14 = sand.u32 1, %s745_s22   ;;  %p1036_p10 = scmp.ne.s32.totalorder %s1026_s27, 0 }
 0x286   : > { %p1037_p13 = scmp.ge.s32.totalorder %s757_s25, 2  ;;  %s405_s8 = scalar_lea.sflag [#allocation6], %s404_s14 }
 0x288   : > { %p580_p3 = pnand %p1037_p13, %p1036_p10 }
 0x28a   : > { %740 = dma.done.wait (!%p580_p3), %s405_s8, 128  }
 0x28b   : > { %742 = vsyncadd (!%p580_p3), %s405_s8, 4294967168  ;;  %p21_p7 = scmp.ge.s32.totalorder %s859_s7, 4   ;;  %s1038_s22 = smov %s749_s23 }
 0x28c   : > { %s1039_s23 = smov %s753_s24  ;;  %s1040_s24 = smov %s890_s1 }
 0x28d   : > { %s1041_s25 = smov %s859_s7  ;;  %23 = sbr.rel (!%p21_p7) target bundleno = 9 (0x9), region = 89 }
 0x294   :  { %410 = vsyncpa [#allocation5], 1 }
 0x295   :  { %412 = vsyncpa [#allocation5 + $0x1], 1 }
 0x296   :  { %413 = vsyncpa [#allocation8], 1 }
 0x297   :  { %414 = vsyncpa [#allocation6], 1 }
 0x298   :  { %416 = vsyncpa [#allocation6 + $0x1], 1 }

// kernel: tpu_custom_call.1
= control target key start
LH: loop header
LB: loop body
LE: loop exit
PB: predicated region body
PF: predicated region fallthrough
CT: control target
= control target key end

     0   :  { %s1016_s0 = inlined_call_operand.<no memory space> [shape: f32[1], index: 0, kind: input, shape index: {}]   ;;  %s1017_s1 = inlined_call_operand.<no memory space> [shape: f32[1], index: 1, kind: input, shape index: {}]   ;;  %s1018_s2 = inlined_call_operand.hbm [shape: f32[16,128], index: 2, kind: input, shape index: {}]   ;;  %s1019_s3 = inlined_call_operand.hbm [shape: f32[128,128], index: 3, kind: input, shape index: {}]   ;;  %s1020_s4 = inlined_call_operand.vmem [shape: f32[1,128], index: 4, kind: input, shape index: {}]   ;;  %s1021_s5 = inlined_call_operand.hbm [shape: f32[16,128], index: 5, kind: output, shape index: {}]  }
   0x1   :  { %10 = sst [smem:[#allocation2]] %s1016_s0 }
   0x2   :  { %11 = sst [smem:[#allocation3]] %s1017_s1 }
   0x3   :  { %12 = vsyncpa [#allocation5], 0 }
   0x4   :  { %14 = vsyncpa [#allocation5 + $0x1], 0 }
   0x5   :  { %15 = vsyncpa [#allocation8], 0 }
   0x6   :  { %16 = vsyncpa [#allocation6], 0 }
   0x7   :  { %18 = vsyncpa [#allocation6 + $0x1], 0  ;;  %s803_s22 = smov 0   ;;  %s805_s23 = smov 0  }
   0x8   :  { %s807_s24 = smov 0   ;;  %s809_s25 = smov 0  }
   0x9 LB: > { %s824_s0 = sadd.s32 4294967295, %s757_s25   ;;  %s472_s1 = sadd.s32 4294967294, %s757_s25   ;;  %s757_s25 = sphi %s809_s25, %s1041_s25   ;;  %s753_s24 = sphi %s807_s24, %s1040_s24   ;;  %s749_s23 = sphi %s805_s23, %s1039_s23   ;;  %s745_s22 = sphi %s803_s22, %s1038_s22  }
   0xa   : > { %p86_p0 = scmp.ne.s32.totalorder %s749_s23, %s745_s22  ;;  %p1022_p1 = scmp.eq.s32.totalorder %s824_s0, 0 }
   0xb   : > { %p158_p3 = scmp.eq.s32.totalorder %s472_s1, 1  ;;  %p473_p5 = scmp.ge.s32.totalorder %s757_s25, 1 }
   0xc   : > { %p833_p4 = por %p1022_p1, %p86_p0  ;;  %p165_p7 = scmp.lt.s32.totalorder %s757_s25, 3 }
   0xd   : > { %p838_p6 = por %p158_p3, %p86_p0  ;;  %s759_s29 = smov [#allocation7]  }
   0xe   : > { %s1025_s26 = scalar_select %p833_p4, 1, 0 }
   0xf   : > { %s1026_s27 = scalar_select %p838_p6, 1, 0 }
  0x10   : > { %p843_p8 = pnand %p473_p5, %p165_p7  ;;  %s183_s30 = sshll.u32 %s759_s29, 4  ;;  %s847_s30 = int_to_ptr.vmem [resolvable:$true] %s183_s30 }
  0x11   : > { %s859_s7 = sadd.s32 1, %s757_s25   ;;  %s73_s8 = sadd.s32 1, %s753_s24 }
  0x12   : > { %s1027_s28 = scalar_select %p843_p8, 1, 0 }
  0x13   : > { %p571_p9 = pneg %p843_p8  ;;  %s70_s9 = ssub.s32 %s757_s25, %s859_s7 }
  0x14   : > { %s629_s12 = scalar_lea.hbm %s1019_s3, 2048 }
  0x15   : > { %p854_p11 = pnand %p571_p9, %p1022_p1  ;;  %p630_p12 = scmp.ne.s32.totalorder %s1019_s3, %s629_s12 }
  0x16   : > { %p636_p5 = scmp.lt.u32.totalorder %s629_s12, %s1019_s3 }
  0x17   : > { %p631_p13 = pneg %p854_p11 }
  0x19   : > { %p632_p0 = pnand %p631_p13, %p630_p12 }
  0x1b   : > { %p633_p3 = pneg %p632_p0 }
  0x1d   : > { %p638_p7 = pnand %p636_p5, %p633_p3 }
  0x1f   : > { %641 = shalt.err (!%p638_p7)
}
  0x20   : > { %s642_s17 = scalar_lea.vmem %s847_s30, 2048  ;;  %p650_p2 = scmp.lt.s32.totalorder %s847_s30, %s847_s30 }
  0x21   : > { %p643_p9 = scmp.ne.s32.totalorder %s847_s30, %s642_s17  ;;  %p651_p6 = scmp.lt.s32.totalorder %s642_s17, %s642_s17 }
  0x23   : > { %p645_p10 = pnand %p643_p9, %p631_p13  ;;  %p652_p4 = por %p651_p6, %p650_p2 }
  0x25   : > { %p646_p1 = pneg %p645_p10 }
  0x27   : > { %p653_p8 = pnand %p652_p4, %p646_p1 }
  0x29   : > { %656 = shalt.err (!%p653_p8)
}
  0x2a   : > { %s760_s18 = smov 128   ;;  %s761_s19 = smov 8  }
  0x2b   : > { %574 = dma.hbm_to_vmem [thread:$0]  (!%p854_p11), %s1019_s3, 2048, %s847_s30, [#allocation8], %s760_s18, %s760_s18, %s761_s19  }
  0x2c   : > { %p71_p2 = scmp.eq.s32.totalorder %s70_s9, 0  ;;  %p80_p1 = scmp.ne.s32.totalorder %s753_s24, %s749_s23 }
  0x2d   : > { %p81_p4 = scmp.eq.s32.totalorder %s757_s25, 0  ;;  %p584_p6 = scmp.lt.s32.totalorder %s757_s25, 2 }
  0x2e   : > { %s890_s1 = scalar_select %p71_p2, %s753_s24, %s73_s8  }
  0x2f   : > { %p82_p8 = por %p81_p4, %p80_p1  ;;  %p1029_p10 = scmp.eq.s32.totalorder %s824_s0, 1 }
  0x30   : > { %s200_s10 = sand.u32 1, %s753_s24   ;;  %s477_s11 = sshll.u32 %s757_s25, 7 }
  0x31   : > { %p894_p12 = por %p1029_p10, %p80_p1  ;;  %s476_s12 = sshll.u32 %s200_s10, 3 }
  0x32   : > { %s903_s14 = scalar_lea.hbm %s1018_s2, %s477_s11  ;;  %s204_s30 = scalar_lea.vmem [#allocation4], %s476_s12 }
  0x33   : > { %s211_s8 = sshll.u32 %s204_s30, 4  ;;  %p905_p11 = pnand %p584_p6, %p82_p8  ;;  %s909_s8 = int_to_ptr.vmem [resolvable:$true] %s211_s8 }
  0x34   : > { %s201_s15 = scalar_lea.sflag [#allocation5], %s200_s10  ;;  %s657_s16 = scalar_lea.hbm %s903_s14, 128 }
  0x35   : > { %p658_p13 = scmp.ne.s32.totalorder %s903_s14, %s657_s16  ;;  %p659_p0 = pneg %p905_p11 }
  0x36   : > { %s662_s19 = scalar_lea.hbm %s1018_s2, 256  ;;  %p663_p7 = scmp.lt.u32.totalorder %s903_s14, %s1018_s2 }
  0x37   : > { %p660_p3 = pnand %p659_p0, %p658_p13  ;;  %p664_p9 = scmp.lt.u32.totalorder %s662_s19, %s657_s16 }
  0x38   : > { %p666_p1 = scmp.lt.u32.totalorder %s657_s16, %s903_s14 }
  0x39   : > { %p661_p5 = pneg %p660_p3  ;;  %p665_p2 = por %p664_p9, %p663_p7 }
  0x3b   : > { %p667_p4 = por %p666_p1, %p665_p2 }
  0x3d   : > { %p668_p6 = pnand %p667_p4, %p661_p5 }
  0x3f   : > { %671 = shalt.err (!%p668_p6)
}
  0x40   : > { %s672_s10 = scalar_lea.vmem %s909_s8, 128  ;;  %s762_s11 = smov [#allocation4]  }
  0x41   : > { %p673_p8 = scmp.ne.s32.totalorder %s909_s8, %s672_s10  ;;  %s677_s12 = sshll.u32 %s762_s11, 4  ;;  %s678_s12 = int_to_ptr.vmem [resolvable:$false] %s677_s12 }
  0x42   : > { %s679_s6 = scalar_lea.vmem %s678_s12, 256  ;;  %p680_p3 = scmp.lt.s32.totalorder %s909_s8, %s678_s12 }
  0x43   : > { %p675_p10 = pnand %p673_p8, %p659_p0  ;;  %p681_p7 = scmp.lt.s32.totalorder %s679_s6, %s672_s10 }
  0x45   : > { %p676_p13 = pneg %p675_p10  ;;  %p682_p9 = por %p681_p7, %p680_p3 }
  0x47   : > { %p683_p2 = pnand %p682_p9, %p676_p13 }
  0x49   : > { %686 = shalt.err (!%p683_p2)
}
  0x4a   : > { %578 = dma.hbm_to_vmem [thread:$0]  (!%p905_p11), %s903_s14, 128, %s909_s8, %s201_s15  }
  0x4b   : > { %p1032_p5 = scmp.ne.s32.totalorder %s1027_s28, 0 }
  0x4c   : > { %s939_s13 = sand.u32 (!%p1032_p5), 1, %s749_s23   ;;  %p1033_p0 = scmp.ne.s32.totalorder (!%p1032_p5), %s1025_s26, 0 }
  0x4d   : > { %220 = sbr.rel (%p1032_p5) target bundleno = 645 (0x285), region = 40  ;;  %s479_s30 = sshll.u32 (!%p1032_p5), %s939_s13, 3 }
  0x4e   : > { %s223_s16 = scalar_lea.sflag (!%p1032_p5), [#allocation5], %s939_s13  ;;  %s226_s17 = scalar_lea.vmem (!%p1032_p5), [#allocation4], %s479_s30 }
  0x54   : > { %732 = dma.done.wait (%p1033_p0), %s223_s16, 128  }
  0x55   : > { %734 = vsyncadd (%p1033_p0), %s223_s16, 4294967168  ;;  %p1034_p11 = scmp.eq.s32.totalorder %s824_s0, 0 }
  0x57   : > { %736 = dma.done.wait (%p1034_p11), [#allocation8], 2048   ;;  %p1035_p1 = pmov %p1034_p11 }
  0x58   : > { %v953_v0 = vld [vmem:[%s226_s17] sm:$0xff]  ;;  %v283_v5 = vld [vmem:[#allocation7] sm:$0xff]  ;;  %v284_v6 = vld [vmem:[#allocation7 + $0x8] sm:$0xff]  ;;  %v763_v8 = vmov 0.0|0.0   ;;  %vm764_vm0 = vmmov 0   ;;  %v765_v20 = vmov 0.0  }
  0x59   : > { %738 = vsyncadd (%p1035_p1), [#allocation8], 4294965248  ;;  %260 = vadd.xlane.f32.xlu0 %v953_v0  ;;  %v540_v7 = vpack.c.bf16 %v284_v6, %v283_v5  ;;  %539 = vmatprep.subr.bf16.mxu0 %v763_v8  ;;  %v285_v9 = vld [vmem:[#allocation7 + $0x10] sm:$0xff]  ;;  %v286_v10 = vld [vmem:[#allocation7 + $0x18] sm:$0xff]  ;;  %s258_s26 = sld [smem:[#allocation2]]  ;;  %s484_s9 = sshll.u32 %s824_s0, 7 }
  0x5a   : > { %v543_v11 = vpack.c.bf16 %v286_v10, %v285_v9  ;;  %v287_v12 = vld [vmem:[#allocation7 + $0x20] sm:$0xff]  ;;  %v288_v13 = vld [vmem:[#allocation7 + $0x28] sm:$0xff]  ;;  %v289_v15 = vld [vmem:[#allocation7 + $0x30] sm:$0xff]  ;;  %536 = vmatprep.mubr.msk.f32.mxu0 %vm764_vm0, %v765_v20  ;;  %s259_s28 = sld [smem:[#allocation3]]  ;;  %s256_s15 = scalar_lea.vmem [#allocation9], %s479_s30 }
  0x5b   : > { %541 = vmatpush3.bf16.msra.mxu0 %v540_v7  ;;  %v546_v14 = vpack.c.bf16 %v288_v13, %v287_v12  ;;  %v290_v16 = vld [vmem:[#allocation7 + $0x38] sm:$0xff]  ;;  %v291_v18 = vld [vmem:[#allocation7 + $0x40] sm:$0xff]  ;;  %v292_v19 = vld [vmem:[#allocation7 + $0x48] sm:$0xff]  ;;  %s392_s18 = sshll.u32 %s256_s15, 4  ;;  %s972_s21 = scalar_lea.hbm %s1021_s5, %s484_s9  ;;  %s974_s18 = int_to_ptr.vmem [resolvable:$true] %s392_s18 }
  0x5c   : > { %542 = vmatprep.subr.bf16.mxu0 %v763_v8  ;;  %v549_v17 = vpack.c.bf16 %v290_v16, %v289_v15  ;;  %v552_v21 = vpack.c.bf16 %v292_v19, %v291_v18  ;;  %v293_v22 = vld [vmem:[#allocation7 + $0x50] sm:$0xff]  ;;  %v294_v23 = vld [vmem:[#allocation7 + $0x58] sm:$0xff]  ;;  %v295_v25 = vld [vmem:[#allocation7 + $0x60] sm:$0xff]  ;;  %s379_s10 = scalar_lea.sflag [#allocation6], %s939_s13  ;;  %s687_s0 = scalar_lea.vmem %s974_s18, 128 }
  0x5d   : > { %v555_v24 = vpack.c.bf16 %v294_v23, %v293_v22  ;;  %v296_v26 = vld [vmem:[#allocation7 + $0x68] sm:$0xff]  ;;  %v297_v28 = vld [vmem:[#allocation7 + $0x70] sm:$0xff]  ;;  %v298_v29 = vld [vmem:[#allocation7 + $0x78] sm:$0xff]  ;;  %p688_p4 = scmp.ne.s32.totalorder %s974_s18, %s687_s0  ;;  %s766_s11 = smov [#allocation9]  }
  0x5e   : > { %v558_v27 = vpack.c.bf16 %v296_v26, %v295_v25  ;;  %v561_v30 = vpack.c.bf16 %v298_v29, %v297_v28  ;;  %v482_v45 = vld [vmem:[%s1020_s4] ss:$0 sm:$0xff]  ;;  %s691_s12 = sshll.u32 %s766_s11, 4  ;;  %s692_s12 = int_to_ptr.vmem [resolvable:$false] %s691_s12 }
  0x5f   : > { %544 = vmatpush3.bf16.msra.mxu0 %v543_v11  ;;  %v277_v39 = vstv %s258_s26  ;;  %p689_p6 = pnand %p688_p4, %p894_p12  ;;  %s693_s6 = scalar_lea.vmem %s692_s12, 256 }
  0x60   : > { %545 = vmatprep.subr.bf16.mxu0 %v763_v8  ;;  %v281_v42 = vstv %s259_s28  ;;  %p694_p10 = scmp.lt.s32.totalorder %s974_s18, %s692_s12  ;;  %p695_p13 = scmp.lt.s32.totalorder %s693_s6, %s687_s0 }
  0x61   : > { %p690_p8 = pneg %p689_p6 }
  0x62   : > { %p696_p3 = por %p695_p13, %p694_p10 }
  0x63   : > { %547 = vmatpush3.bf16.msra.mxu0 %v546_v14 }
  0x64   : > { %548 = vmatprep.subr.bf16.mxu0 %v763_v8  ;;  %p697_p7 = pnand %p696_p3, %p690_p8 }
  0x67   : > { %550 = vmatpush3.bf16.msra.mxu0 %v549_v17 }
  0x68   : > { %551 = vmatprep.subr.bf16.mxu0 %v763_v8 }
  0x6b   : > { %553 = vmatpush3.bf16.msra.mxu0 %v552_v21 }
  0x6c   : > { %554 = vmatprep.subr.bf16.mxu0 %v763_v8 }
  0x6f   : > { %556 = vmatpush3.bf16.msra.mxu0 %v555_v24 }
  0x70   : > { %557 = vmatprep.subr.bf16.mxu0 %v763_v8 }
  0x73   : > { %559 = vmatpush3.bf16.msra.mxu0 %v558_v27 }
  0x74   : > { %560 = vmatprep.subr.bf16.mxu0 %v763_v8 }
  0x77   : > { %562 = vmatpush3.bf16.msra.mxu0 %v561_v30 }
  0xe6   : > { %v261_v1 = vpop.xlane.xlu0 %260 }
  0xe7   : > { %v263_v2 = vmul.f32 0.0078125, %v261_v1 }
  0xe9   : > { %v957_v3 = vsub.f32 %v953_v0, %v263_v2 }
  0xeb   : > { %v265_v4 = vmul.f32 %v957_v3, %v957_v3 }
  0xed   : > { %266 = vadd.xlane.f32.xlu0 %v265_v4 }
 0x17a   : > { %v267_v31 = vpop.xlane.xlu0 %266 }
 0x17b   : > { %v268_v32 = vmul.f32 0.007874016, %v267_v31 }
 0x17d   : > { %625 = vrsqrt.f32 %v268_v32  ;;  %vm271_vm1 = vcmp.eq.f32.partialorder %v268_v32, inf  ;;  %v274_v35 = vand.u32 2147483648, %v268_v32  ;;  %vm273_vm2 = vcmp.eq.f32.partialorder %v268_v32, 0.0 }
 0x187   : > { %v626_v33 = vpop.eup %625 }
 0x188   : > { %v270_v34 = vmul.f32 %v626_v33, %v268_v32 }
 0x18a   : > { %v272_v36 = vsel %vm271_vm1, %v268_v32, %v270_v34 }
 0x18b   : > { %v275_v37 = vsel %vm273_vm2, %v274_v35, %v272_v36 }
 0x18c   : > { %v276_v38 = vadd.f32 1e-06, %v275_v37 }
 0x18e   : > { %627 = vrcp.f32 %v276_v38 }
 0x198   : > { %v628_v40 = vpop.eup %627 }
 0x199   : > { %v279_v41 = vmul.f32 %v628_v40, %v277_v39 }
 0x19b   : > { %v280_v43 = vmul.f32 %v279_v41, %v957_v3 }
 0x19d   : > { %v282_v44 = vadd.f32 %v281_v42, %v280_v43 }
 0x19f   : > { %537 = vmatmul.mubr.f32.vlgmr.msra.gmra.mrb[0].mxu0 %v282_v44 }
 0x272   : > { %v372_v46 = vpop.f32.mrb[0].mxu0 }
 0x273   : > { %v373_v47 = vadd.f32 %v482_v45, %v372_v46  ;;  %v538_v48 = vpop.f32.mrb[1].mxu0 }
 0x275   : > { %v376_v49 = vadd.f32 %v373_v47, %v953_v0 }
 0x277   : > { %377 = vst [vmem:[%s256_s15] sm:$0xff] %v376_v49 }
 0x278   : > { %700 = shalt.err (!%p697_p7)
}
 0x279   : > { %s701_s13 = scalar_lea.hbm %s972_s21, 128  ;;  %s705_s17 = scalar_lea.hbm %s1021_s5, 256 }
 0x27a   : > { %p702_p9 = scmp.ne.s32.totalorder %s972_s21, %s701_s13  ;;  %p706_p0 = scmp.lt.u32.totalorder %s972_s21, %s1021_s5 }
 0x27b   : > { %p707_p11 = scmp.lt.u32.totalorder %s705_s17, %s701_s13  ;;  %p709_p4 = scmp.lt.u32.totalorder %s701_s13, %s972_s21 }
 0x27c   : > { %p703_p2 = pnand %p702_p9, %p894_p12 }
 0x27d   : > { %p708_p1 = por %p707_p11, %p706_p0 }
 0x27e   : > { %p704_p5 = pneg %p703_p2 }
 0x27f   : > { %p710_p6 = por %p709_p4, %p708_p1 }
 0x281   : > { %p711_p8 = pnand %p710_p6, %p704_p5 }
 0x283   : > { %714 = shalt.err (!%p711_p8)
}
 0x284   : > { %569 = dma.vmem_to_hbm [thread:$0]  (%p894_p12), %s974_s18, 128, %s972_s21, %s379_s10  }
 0x285 PF: > { %s404_s14 = sand.u32 1, %s745_s22   ;;  %p1036_p10 = scmp.ne.s32.totalorder %s1026_s27, 0 }
 0x286   : > { %p1037_p13 = scmp.ge.s32.totalorder %s757_s25, 2  ;;  %s405_s8 = scalar_lea.sflag [#allocation6], %s404_s14 }
 0x288   : > { %p580_p3 = pnand %p1037_p13, %p1036_p10 }
 0x28a   : > { %740 = dma.done.wait (!%p580_p3), %s405_s8, 128  }
 0x28b   : > { %742 = vsyncadd (!%p580_p3), %s405_s8, 4294967168  ;;  %p21_p7 = scmp.ge.s32.totalorder %s859_s7, 4   ;;  %s1038_s22 = smov %s749_s23 }
 0x28c   : > { %s1039_s23 = smov %s753_s24  ;;  %s1040_s24 = smov %s890_s1 }
 0x28d   : > { %s1041_s25 = smov %s859_s7  ;;  %23 = sbr.rel (!%p21_p7) target bundleno = 9 (0x9), region = 89 }
 0x294   :  { %410 = vsyncpa [#allocation5], 1 }
 0x295   :  { %412 = vsyncpa [#allocation5 + $0x1], 1 }
 0x296   :  { %413 = vsyncpa [#allocation8], 1 }
 0x297   :  { %414 = vsyncpa [#allocation6], 1 }
 0x298   :  { %416 = vsyncpa [#allocation6 + $0x1], 1 }

</bundles_post_ra>
